<compile_context>
chip_gen: v6e
topology: v6e:2x2x1
jax: 0.10.0
libtpu: 0.0.40
codegen_flags: <defaults>
</compile_context>

<pallas_src>
import math

import jax
import jax.numpy as jnp
from jax.experimental import pallas as pl
from jax.experimental.pallas import tpu as pltpu


def _round_up(x, m):
    return ((x + m - 1) // m) * m


def _pick_tile(padded_dim, candidates):
    """Largest candidate tile that evenly divides the padded dimension."""
    for c in candidates:
        if padded_dim % c == 0:
            return c
    return padded_dim


# ---------------------------------------------------------------------------
# Kernel 1: integer-id path -- DMA row gather.
# ---------------------------------------------------------------------------
def _gather_rows_kernel(ids_ref, w_hbm, o_ref, row_buf, sems):
    """out[i*TM + j, :] = W[ids[i*TM + j], :]  via per-row async DMA.

    ids_ref : SMEM (Npad,) int32        (scalar prefetch)
    w_hbm   : HBM  (V, Dpad)            (memory_space=pl.ANY; never copied whole)
    o_ref   : VMEM (TM, Dpad) out tile
    row_buf : VMEM (TM, Dpad) scratch
    sems    : DMA semaphores (TM,)
    """
    i = pl.program_id(0)
    tm = o_ref.shape[0]

    def _start(j, carry):
        row = ids_ref[i * tm + j]
        pltpu.make_async_copy(w_hbm.at[row], row_buf.at[j], sems.at[j]).start()
        return carry

    jax.lax.fori_loop(0, tm, _start, 0)

    def _wait(j, carry):
        # Only shape / semaphore identity matter for the wait.
        pltpu.make_async_copy(w_hbm.at[0], row_buf.at[j], sems.at[j]).wait()
        return carry

    jax.lax.fori_loop(0, tm, _wait, 0)

    o_ref[...] = row_buf[...]


# ---------------------------------------------------------------------------
# Kernel 2: float-mask path -- tiled matmul with f32 accumulator.
# ---------------------------------------------------------------------------
def _soft_matmul_kernel(m_ref, w_ref, o_ref, acc_ref):
    """out_tile(i,j) = sum_k mask(i,k) @ W(k,j); K is the last grid axis."""
    k = pl.program_id(2)

    @pl.when(k == 0)
    def _():
        acc_ref[...] = jnp.zeros_like(acc_ref)

    acc_ref[...] += jnp.dot(
        m_ref[...], w_ref[...], preferred_element_type=jnp.float32
    )

    @pl.when(k == pl.num_programs(2) - 1)
    def _():
        o_ref[...] = acc_ref[...].astype(o_ref.dtype)


# ---------------------------------------------------------------------------
# Wrappers
# ---------------------------------------------------------------------------
def _lookup_forward(ids, weight):
    """ids: int [...]; weight: [V, D]  ->  [..., D]  (gather)."""
    v, d = weight.shape
    lead = ids.shape
    n = math.prod(lead)

    d_pad = _round_up(d, 128)
    w = weight if d_pad == d else jnp.pad(weight, ((0, 0), (0, d_pad - d)))

    ids_flat = ids.reshape(n).astype(jnp.int32)
    n_pad8 = _round_up(n, 8)
    tm = _pick_tile(n_pad8, (128, 64, 32, 16, 8))
    n_pad = _round_up(n, tm)
    if n_pad != n:
        ids_flat = jnp.pad(ids_flat, (0, n_pad - n))  # pad with id 0; sliced off

    out = pl.pallas_call(
        _gather_rows_kernel,
        out_shape=jax.ShapeDtypeStruct((n_pad, d_pad), weight.dtype),
        grid_spec=pltpu.PrefetchScalarGridSpec(
            num_scalar_prefetch=1,
            grid=(n_pad // tm,),
            in_specs=[pl.BlockSpec(memory_space=pl.ANY)],  # weight stays in HBM
            out_specs=pl.BlockSpec((tm, d_pad), lambda i, ids_s: (i, 0)),
            scratch_shapes=[
                pltpu.VMEM((tm, d_pad), weight.dtype),
                pltpu.SemaphoreType.DMA((tm,)),
            ],
        ),
        compiler_params=pltpu.CompilerParams(dimension_semantics=("parallel",)),
        cost_estimate=pl.CostEstimate(
            flops=0,
            transcendentals=0,
            bytes_accessed=2 * n_pad * d_pad * 4 + n_pad * 4,
        ),
    )(ids_flat, w)

    return out[:n, :d].reshape(*lead, d)


def _soft_forward(mask, weight):
    """mask: float [..., V]; weight: [V, D]  ->  [..., D]  (mask @ W)."""
    v, d = weight.shape
    assert mask.shape[-1] == v
    lead = mask.shape[:-1]
    n = math.prod(lead)
    mask2d = mask.reshape(n, v)

    n_pad8 = _round_up(n, 8)
    tm = _pick_tile(n_pad8, (256, 128, 64, 32, 16, 8))
    n_pad = _round_up(n, tm)

    v_pad128 = _round_up(v, 128)
    tk = _pick_tile(v_pad128, (512, 384, 256, 128))
    v_pad = _round_up(v, tk)

    d_pad = _round_up(d, 128)
    td = _pick_tile(d_pad, (512, 384, 256, 128))

    if (n_pad, v_pad) != (n, v):
        mask2d = jnp.pad(mask2d, ((0, n_pad - n), (0, v_pad - v)))
    w = weight
    if (v_pad, d_pad) != (v, d):
        w = jnp.pad(weight, ((0, v_pad - v), (0, d_pad - d)))

    out = pl.pallas_call(
        _soft_matmul_kernel,
        out_shape=jax.ShapeDtypeStruct((n_pad, d_pad), weight.dtype),
        grid_spec=pltpu.PrefetchScalarGridSpec(
            num_scalar_prefetch=0,
            grid=(n_pad // tm, d_pad // td, v_pad // tk),  # reduction (V) last
            in_specs=[
                pl.BlockSpec((tm, tk), lambda i, j, k: (i, k)),
                pl.BlockSpec((tk, td), lambda i, j, k: (k, j)),
            ],
            out_specs=pl.BlockSpec((tm, td), lambda i, j, k: (i, j)),
            scratch_shapes=[pltpu.VMEM((tm, td), jnp.float32)],
        ),
        compiler_params=pltpu.CompilerParams(
            dimension_semantics=("parallel", "parallel", "arbitrary")
        ),
        cost_estimate=pl.CostEstimate(
            flops=2 * n_pad * v_pad * d_pad,
            transcendentals=0,
            bytes_accessed=4 * (n_pad * v_pad + v_pad * d_pad + n_pad * d_pad),
        ),
    )(mask2d, w)

    return out[:n, :d].reshape(*lead, d)


def embedding_forward(mask, weight):
    """Pallas equivalent of Embedding_.forward.

    mask   : int [B, S]  (lookup)   OR   float [..., V]  (matmul)
    weight : float [V, D]
    """
    if mask.ndim == 2:
        assert jnp.issubdtype(mask.dtype, jnp.integer), "2-D mask must be integer ids"
        return _lookup_forward(mask, weight)
    assert jnp.issubdtype(mask.dtype, jnp.floating), "non-2-D mask must be float"
    # TODO(synk): optional bf16 cast of mask/weight for 2-4x MXU throughput on
    # v6e/v7x (kept f32 here to match the torch f32 reference exactly).
    return _soft_forward(mask, weight)


# ---------------------------------------------------------------------------
# Demo / self-check
# ---------------------------------------------------------------------------
if __name__ == "__main__":
    key = jax.random.PRNGKey(0)
    k_w, k_ids, k_soft, k_w2, k_ids2, k_soft2 = jax.random.split(key, 6)

    # ---- aligned shapes ---------------------------------------------------
    B, S, V, D = 2, 8, 64, 128
    weight = jax.random.normal(k_w, (V, D), dtype=jnp.float32) * 0.02

    ids = jax.random.randint(k_ids, (B, S), 0, V, dtype=jnp.int32)
    out_lookup = jax.block_until_ready(embedding_forward(ids, weight))
    ref_lookup = jnp.take(weight, ids, axis=0)
    assert out_lookup.shape == (B, S, D)
    assert jnp.allclose(out_lookup, ref_lookup, atol=1e-5)

    soft = jax.nn.softmax(
        jax.random.normal(k_soft, (B, S, V), dtype=jnp.float32), axis=-1
    )
    out_soft = jax.block_until_ready(embedding_forward(soft, weight))
    ref_soft = jnp.matmul(soft, weight)
    assert out_soft.shape == (B, S, D)
    assert jnp.allclose(out_soft, ref_soft, atol=1e-4)

    # ---- ragged shapes (exercise padding / remainder handling) -------------
    B2, S2, V2, D2 = 2, 5, 100, 96
    weight2 = jax.random.normal(k_w2, (V2, D2), dtype=jnp.float32) * 0.02

    ids2 = jax.random.randint(k_ids2, (B2, S2), 0, V2, dtype=jnp.int32)
    out_l2 = jax.block_until_ready(embedding_forward(ids2, weight2))
    assert out_l2.shape == (B2, S2, D2)
    assert jnp.allclose(out_l2, jnp.take(weight2, ids2, axis=0), atol=1e-5)

    soft2 = jax.nn.softmax(
        jax.random.normal(k_soft2, (B2, S2, V2), dtype=jnp.float32), axis=-1
    )
    out_s2 = jax.block_until_ready(embedding_forward(soft2, weight2))
    assert out_s2.shape == (B2, S2, D2)
    assert jnp.allclose(out_s2, jnp.matmul(soft2, weight2), atol=1e-4)

    print("KERNEL_OK")
</pallas_src>

<mosaic_0001>
module attributes {stable_mosaic.version = 11 : i64} {
  func.func @_gather_rows_kernel(%arg0: i32, %arg1: memref<16xi32, #tpu.memory_space<smem>>, %arg2: memref<64x128xf32, #tpu.memory_space<any>>, %arg3: memref<16x128xf32, #tpu.memory_space<vmem>>, %arg4: memref<16x128xf32, #tpu.memory_space<vmem>>, %arg5: memref<16x!tpu.dma_semaphore, #tpu.memory_space<semaphore_mem>>) attributes {dimension_semantics = [#tpu.dimension_semantics<parallel>], iteration_bounds = array<i64: 1>, scalar_prefetch = 1 : i64, scratch_operands = 2 : i64, tpu.core_type = #tpu.core_type<tc>, window_params = [{}, {transform_indices = @transform_1, window_bounds = array<i64: 16, 128>}]} {
    %c0_i32 = arith.constant 0 : i32
    %c16_i32 = arith.constant 16 : i32
    %0 = arith.addi %c0_i32, %c16_i32 : i32
    %c1_i32 = arith.constant 1 : i32
    scf.for %arg6 = %c0_i32 to %0 step %c1_i32  : i32 {
      %c16_i32_8 = arith.constant 16 : i32
      %4 = arith.muli %arg0, %c16_i32_8 : i32
      %5 = arith.addi %4, %arg6 : i32
      %6 = arith.index_cast %5 : i32 to index
      %7 = memref.load %arg1[%6] : memref<16xi32, #tpu.memory_space<smem>>
      %c0_i32_9 = arith.constant 0 : i32
      %8 = tpu.memref_slice %arg2[%7, %c0_i32_9] : memref<64x128xf32, #tpu.memory_space<any>> -> memref<1x128xf32, #tpu.memory_space<any>>
      %9 = tpu.memref_squeeze %8 : memref<1x128xf32, #tpu.memory_space<any>> -> memref<128xf32, #tpu.memory_space<any>>
      %c0_i32_10 = arith.constant 0 : i32
      %10 = tpu.memref_slice %arg4[%arg6, %c0_i32_10] : memref<16x128xf32, #tpu.memory_space<vmem>> -> memref<1x128xf32, #tpu.memory_space<vmem>>
      %11 = tpu.memref_squeeze %10 : memref<1x128xf32, #tpu.memory_space<vmem>> -> memref<128xf32, #tpu.memory_space<vmem>>
      %12 = tpu.memref_slice %arg5[%arg6] : memref<16x!tpu.dma_semaphore, #tpu.memory_space<semaphore_mem>> -> memref<1x!tpu.dma_semaphore, #tpu.memory_space<semaphore_mem>>
      %13 = tpu.memref_squeeze %12 : memref<1x!tpu.dma_semaphore, #tpu.memory_space<semaphore_mem>> -> memref<!tpu.dma_semaphore, #tpu.memory_space<semaphore_mem>>
      tpu.enqueue_dma source(%9 : memref<128xf32, #tpu.memory_space<any>>) target(%11 : memref<128xf32, #tpu.memory_space<vmem>>) target_semaphore(%13 : memref<!tpu.dma_semaphore, #tpu.memory_space<semaphore_mem>>)
    }
    %c16_i32_0 = arith.constant 16 : i32
    %c0_i32_1 = arith.constant 0 : i32
    %c16_i32_2 = arith.constant 16 : i32
    %1 = arith.addi %c0_i32_1, %c16_i32_2 : i32
    %c1_i32_3 = arith.constant 1 : i32
    scf.for %arg6 = %c0_i32_1 to %1 step %c1_i32_3  : i32 {
      %c0_i32_8 = arith.constant 0 : i32
      %c0_i32_9 = arith.constant 0 : i32
      %4 = tpu.memref_slice %arg2[%c0_i32_8, %c0_i32_9] : memref<64x128xf32, #tpu.memory_space<any>> -> memref<1x128xf32, #tpu.memory_space<any>>
      %5 = tpu.memref_squeeze %4 : memref<1x128xf32, #tpu.memory_space<any>> -> memref<128xf32, #tpu.memory_space<any>>
      %c0_i32_10 = arith.constant 0 : i32
      %6 = tpu.memref_slice %arg4[%arg6, %c0_i32_10] : memref<16x128xf32, #tpu.memory_space<vmem>> -> memref<1x128xf32, #tpu.memory_space<vmem>>
      %7 = tpu.memref_squeeze %6 : memref<1x128xf32, #tpu.memory_space<vmem>> -> memref<128xf32, #tpu.memory_space<vmem>>
      %8 = tpu.memref_slice %arg5[%arg6] : memref<16x!tpu.dma_semaphore, #tpu.memory_space<semaphore_mem>> -> memref<1x!tpu.dma_semaphore, #tpu.memory_space<semaphore_mem>>
      %9 = tpu.memref_squeeze %8 : memref<1x!tpu.dma_semaphore, #tpu.memory_space<semaphore_mem>> -> memref<!tpu.dma_semaphore, #tpu.memory_space<semaphore_mem>>
      tpu.wait_dma2 semaphore(%9 : memref<!tpu.dma_semaphore, #tpu.memory_space<semaphore_mem>>) src(%5 : memref<128xf32, #tpu.memory_space<any>>) dst(%7 : memref<128xf32, #tpu.memory_space<vmem>>)
    }
    %c16_i32_4 = arith.constant 16 : i32
    %c0 = arith.constant 0 : index
    %c0_5 = arith.constant 0 : index
    %2 = vector.load %arg4[%c0, %c0_5] : memref<16x128xf32, #tpu.memory_space<vmem>>, vector<16x128xf32>
    %c0_6 = arith.constant 0 : index
    %c0_7 = arith.constant 0 : index
    %3 = vector.load %arg3[%c0_6, %c0_7] : memref<16x128xf32, #tpu.memory_space<vmem>>, vector<16x128xf32>
    tpu.vector_store %arg3[%c0_6, %c0_7], %2 {strides = array<i32>} : memref<16x128xf32, #tpu.memory_space<vmem>>, vector<16x128xf32>,
    return
  }
  func.func @transform_1(%arg0: i32, %arg1: memref<16xi32, #tpu.memory_space<smem>>) -> (i32, i32) {
    %c0_i32 = arith.constant 0 : i32
    %c0_i32_0 = arith.constant 0 : i32
    return %arg0, %c0_i32 : i32, i32
  }
}

</mosaic_0001>

<bundles_post_ra>
// kernel: tpu_custom_call.1
= control target key start
LH: loop header
LB: loop body
LE: loop exit
PB: predicated region body
PF: predicated region fallthrough
CT: control target
= control target key end

     0   :  { %s300_s9 = smov [#allocation5]   ;;  %s346_s0 = inlined_call_operand.hbm [shape: s32[16], index: 0, kind: input, shape index: {}]   ;;  %s347_s1 = inlined_call_operand.hbm [shape: f32[64,128], index: 1, kind: input, shape index: {}]   ;;  %s348_s2 = inlined_call_operand.hbm [shape: f32[16,128], index: 2, kind: output, shape index: {}]  }
   0x1   :  { %8 = dma.hbm_to_smem %s346_s0, 16, %s300_s9, [#allocation4] }
   0x2   :  { %286 = dma.done.wait [#allocation4], 16 }
   0x3   :  { %287 = vsyncadd [#allocation4], 4294967280 }
   0x4   :  { %10 = sfence }
   0x5   :  { %11 = vsyncpa [#allocation7], 0  ;;  %s323_s12 = smov 0  }
   0x6 LB: > { %s20_s13 = sld [smem:[#allocation5 + %s294_s12]]  ;;  %s23_s14 = scalar_lea.vmem [#allocation2], %s294_s12  ;;  %s294_s12 = sphi %s323_s12, %s17_s12  }
   0x7   : > { %s32_s15 = sshll.u32 %s23_s14, 4  ;;  %s24_s19 = scalar_lea.sflag [#allocation3], %s294_s12  ;;  %s33_s15 = int_to_ptr.vmem [resolvable:$true] %s32_s15 }
   0x8   : > { %s238_s23 = scalar_lea.hbm %s347_s1, 1024 }
   0xc   : > { %s191_s16 = sshll.u32 %s20_s13, 4 }
   0xd   : > { %s22_s18 = scalar_lea.hbm %s347_s1, %s191_s16 }
   0xe   : > { %s236_s20 = scalar_lea.hbm %s22_s18, 16  ;;  %p239_p1 = scmp.lt.s32.totalorder %s22_s18, %s347_s1 }
   0xf   : > { %p237_p0 = scmp.ne.s32.totalorder %s22_s18, %s236_s20  ;;  %p240_p2 = scmp.lt.s32.totalorder %s238_s23, %s236_s20 }
  0x11   : > { %p241_p3 = por %p240_p2, %p239_p1 }
  0x13   : > { %p242_p4 = pnand %p241_p3, %p237_p0 }
  0x15   : > { %245 = shalt.err (!%p242_p4)  }
  0x16   : > { %s246_s26 = scalar_lea.vmem %s33_s15, 16  ;;  %s301_s27 = smov [#allocation2]  }
  0x17   : > { %p247_p5 = scmp.ne.s32.totalorder %s33_s15, %s246_s26  ;;  %s248_s28 = sshll.u32 %s301_s27, 4  ;;  %s249_s28 = int_to_ptr.vmem [resolvable:$false] %s248_s28 }
  0x18   : > { %s250_s29 = scalar_lea.vmem %s249_s28, 256  ;;  %p251_p6 = scmp.lt.s32.totalorder %s33_s15, %s249_s28 }
  0x19   : > { %p252_p7 = scmp.lt.s32.totalorder %s250_s29, %s246_s26 }
  0x1b   : > { %p253_p8 = por %p252_p7, %p251_p6 }
  0x1d   : > { %p254_p9 = pnand %p253_p8, %p247_p5 }
  0x1f   : > { %257 = shalt.err (!%p254_p9)  }
  0x20   : > { %35 = dma.hbm_to_vmem [thread:$0]  %s22_s18, 16, %s33_s15, %s24_s19 }
  0x21   : > { %s17_s12 = sadd.s32 1, %s294_s12  }
  0x22   : > { %p14_p10 = scmp.ge.s32.totalorder %s17_s12, 16  }
  0x23   :  { %s296_s30 = smov (%p14_p10), 0  }
  0x24   :  { %16 = sbr.rel (!%p14_p10) target bundleno = 6 (0x6), region = 57 }
  0x29 LB: > { %s42_s3 = scalar_lea.sflag [#allocation3], %s298_s30  ;;  %s298_s30 = sphi %s296_s30, %s41_s30  }
  0x2a   : > { %288 = dma.done.wait %s42_s3, 16 }
  0x2b   : > { %289 = vsyncadd %s42_s3, 4294967280  ;;  %s41_s30 = sadd.s32 1, %s298_s30  }
  0x2c   : > { %p38_p11 = scmp.ge.s32.totalorder %s41_s30, 16  }
  0x2d   :  { %v45_v0 = vld [vmem:[#allocation2] sm:$0xff] (%p38_p11)  ;;  %v46_v1 = vld [vmem:[#allocation2 + $0x8] sm:$0xff] (%p38_p11)  ;;  %s302_s4 = smov (%p38_p11), [#allocation6]  }
  0x2e   :  { %40 = sbr.rel (!%p38_p11) target bundleno = 41 (0x29), region = 68  ;;  %47 = vst [vmem:[#allocation6] sm:$0xff] (%p38_p11), %v45_v0  ;;  %48 = vst [vmem:[#allocation6 + $0x8] sm:$0xff] (%p38_p11), %v46_v1  ;;  %s54_s5 = sshll.u32 (%p38_p11), %s302_s4, 4  ;;  %s55_s5 = int_to_ptr.vmem [resolvable:$true] %s54_s5 }
  0x2f   :  { %s258_s6 = scalar_lea.vmem (%p38_p11), %s55_s5, 256  ;;  %p263_p13 = scmp.lt.s32.totalorder (%p38_p11), %s55_s5, %s55_s5 }
  0x30   :  { %p259_p12 = scmp.ne.s32.totalorder (%p38_p11), %s55_s5, %s258_s6  ;;  %p264_p0 = scmp.lt.s32.totalorder (%p38_p11), %s258_s6, %s258_s6 }
  0x32   :  { %p265_p1 = por (%p38_p11), %p264_p0, %p263_p13 }
  0x34   :  { %p266_p2 = pnand %p265_p1, %p259_p12 }
  0x36   :  { %269 = shalt.err (!%p266_p2)
}
  0x37   :  { %s303_s1 = smov 128   ;;  %s304_s7 = smov 8  }
  0x38   :  { %60 = dma.vmem_to_hbm [thread:$0]  %s55_s5, 256, %s348_s2, [#allocation7], %s303_s1, %s303_s1, %s304_s7  }
  0x39   :  { %290 = dma.done.wait [#allocation7], 256  }
  0x3a   :  { %291 = vsyncadd [#allocation7], 4294967040 }
  0x3b   :  { %64 = vsyncpa [#allocation7], 1 }
  0x3c   :  { %65 = vsyncmov [#allocation3] }
  0x3f   :  { %s66_s10 = vpop.sfrf %65 }
  0x40   :  { %p192_p3 = scmp.ne.s32.totalorder %s66_s10, 0 }
  0x42   :  { %70 = shalt.err (%p192_p3)  }
  0x43   :  { %72 = vsyncmov [#allocation3 + $0x1] }
  0x46   :  { %s73_s11 = vpop.sfrf %72 }
  0x47   :  { %p193_p4 = scmp.ne.s32.totalorder %s73_s11, 0 }
  0x49   :  { %77 = shalt.err (%p193_p4)  }
  0x4a   :  { %79 = vsyncmov [#allocation3 + $0x2] }
  0x4d   :  { %s80_s12 = vpop.sfrf %79 }
  0x4e   :  { %p194_p5 = scmp.ne.s32.totalorder %s80_s12, 0 }
  0x50   :  { %84 = shalt.err (%p194_p5)  }
  0x51   :  { %86 = vsyncmov [#allocation3 + $0x3] }
  0x54   :  { %s87_s13 = vpop.sfrf %86 }
  0x55   :  { %p195_p6 = scmp.ne.s32.totalorder %s87_s13, 0 }
  0x57   :  { %91 = shalt.err (%p195_p6)  }
  0x58   :  { %93 = vsyncmov [#allocation3 + $0x4] }
  0x5b   :  { %s94_s2 = vpop.sfrf %93 }
  0x5c   :  { %p196_p7 = scmp.ne.s32.totalorder %s94_s2, 0 }
  0x5e   :  { %98 = shalt.err (%p196_p7)  }
  0x5f   :  { %100 = vsyncmov [#allocation3 + $0x5] }
  0x62   :  { %s101_s14 = vpop.sfrf %100 }
  0x63   :  { %p197_p8 = scmp.ne.s32.totalorder %s101_s14, 0 }
  0x65   :  { %105 = shalt.err (%p197_p8)  }
  0x66   :  { %107 = vsyncmov [#allocation3 + $0x6] }
  0x69   :  { %s108_s15 = vpop.sfrf %107 }
  0x6a   :  { %p198_p9 = scmp.ne.s32.totalorder %s108_s15, 0 }
  0x6c   :  { %112 = shalt.err (%p198_p9)  }
  0x6d   :  { %114 = vsyncmov [#allocation3 + $0x7] }
  0x70   :  { %s115_s16 = vpop.sfrf %114 }
  0x71   :  { %p199_p10 = scmp.ne.s32.totalorder %s115_s16, 0 }
  0x73   :  { %119 = shalt.err (%p199_p10)  }
  0x74   :  { %121 = vsyncmov [#allocation3 + $0x8] }
  0x77   :  { %s122_s0 = vpop.sfrf %121 }
  0x78   :  { %p200_p11 = scmp.ne.s32.totalorder %s122_s0, 0 }
  0x7a   :  { %126 = shalt.err (%p200_p11)  }
  0x7b   :  { %128 = vsyncmov [#allocation3 + $0x9] }
  0x7e   :  { %s129_s17 = vpop.sfrf %128 }
  0x7f   :  { %p201_p12 = scmp.ne.s32.totalorder %s129_s17, 0 }
  0x81   :  { %133 = shalt.err (%p201_p12)  }
  0x82   :  { %135 = vsyncmov [#allocation3 + $0xa] }
  0x85   :  { %s136_s18 = vpop.sfrf %135 }
  0x86   :  { %p202_p13 = scmp.ne.s32.totalorder %s136_s18, 0 }
  0x88   :  { %140 = shalt.err (%p202_p13)  }
  0x89   :  { %142 = vsyncmov [#allocation3 + $0xb] }
  0x8c   :  { %s143_s19 = vpop.sfrf %142 }
  0x8d   :  { %p203_p0 = scmp.ne.s32.totalorder %s143_s19, 0 }
  0x8f   :  { %147 = shalt.err (%p203_p0)  }
  0x90   :  { %149 = vsyncmov [#allocation3 + $0xc] }
  0x93   :  { %s150_s20 = vpop.sfrf %149 }
  0x94   :  { %p204_p1 = scmp.ne.s32.totalorder %s150_s20, 0 }
  0x96   :  { %154 = shalt.err (%p204_p1)  }
  0x97   :  { %156 = vsyncmov [#allocation3 + $0xd] }
  0x9a   :  { %s157_s21 = vpop.sfrf %156 }
  0x9b   :  { %p205_p2 = scmp.ne.s32.totalorder %s157_s21, 0 }
  0x9d   :  { %161 = shalt.err (%p205_p2)  }
  0x9e   :  { %163 = vsyncmov [#allocation3 + $0xe] }
  0xa1   :  { %s164_s22 = vpop.sfrf %163 }
  0xa2   :  { %p206_p3 = scmp.ne.s32.totalorder %s164_s22, 0 }
  0xa4   :  { %168 = shalt.err (%p206_p3)  }
  0xa5   :  { %170 = vsyncmov [#allocation3 + $0xf] }
  0xa8   :  { %s171_s23 = vpop.sfrf %170 }
  0xa9   :  { %p207_p4 = scmp.ne.s32.totalorder %s171_s23, 0 }
  0xab   :  { %175 = shalt.err (%p207_p4)  }

</bundles_post_ra>
